<compile_context>
chip_gen: v7x
topology: tpu7x:2x2x1
jax: 0.10.0
libtpu: 0.0.40
codegen_flags: <defaults>
</compile_context>

<pallas_src>
import functools

import jax
import jax.numpy as jnp
from jax import lax
from jax.experimental import pallas as pl
from jax.experimental.pallas import tpu as pltpu

_EPS = 1e-5


@functools.lru_cache(maxsize=1)
def _vmem_limit_bytes():
    """Generation-aware scoped-VMEM budget (~3/4 of physical capacity)."""
    try:
        cap = int(pltpu.get_tpu_info().vmem_capacity_bytes)
    except Exception:                       # query unavailable -> safe default
        cap = 64 * 1024 * 1024
    return min(cap * 3 // 4, 100 * 1024 * 1024)


def _fold_weights(w_hwio, W):
    """HWIO (3,3,Cin,Cout) -> block-Toeplitz (3, (W+1)*Cin, W*Cout).

    For each dy the folded matrix maps one full lane-flattened padded row
    (W data columns + one shared right-halo zero column) straight to one
    lane-flattened output row (W*Cout).  Left-halo taps are dropped (they
    multiply exact zeros).  Every entry is a plain copy of one original
    weight (or 0), so casting to bf16 afterwards equals casting the original
    weights.
    """
    Kh, Kw, Cin, Cout = w_hwio.shape
    assert Kh == 3 and Kw == 3, "DoubleConv uses 3x3 kernels"
    Wc = W + 1
    wo = jnp.arange(W)
    wi = jnp.arange(Wc)
    dx = jnp.arange(Kw)
    # sel[dx, wo, wi] == 1 iff padded input column (wi+1) feeds output column
    # wo at horizontal tap dx  (data col wi holds padded col wi+1).
    sel = (wo[None, :, None] + dx[:, None, None] == wi[None, None, :] + 1)
    sel = sel.astype(w_hwio.dtype)                        # (Kw, W, Wc)
    wb = jnp.einsum('xwv,yxio->yviwo', sel, w_hwio)       # (Kh, Wc, Cin, W, Cout)
    return wb.reshape(Kh, Wc * Cin, W * Cout)


def _make_fused_conv_kernel(apply_act, *, H, W, Cin, Cout):
    Wc = W + 1   # data columns + one shared zero column (right halo)

    def kernel(x_ref, w_ref, s_ref, b_ref,       # inputs
               y_ref, psum_ref, pssq_ref,        # outputs
               xp_ref):                          # bf16 halo scratch
        # ---- prologue: previous block's folded BN affine + ReLU (f32) -------
        a = x_ref[0]                                         # (H, W*Cin)
        if apply_act:
            a = jnp.maximum(a.astype(jnp.float32) * s_ref[...] + b_ref[...], 0.0)
        a16 = a.astype(jnp.bfloat16)            # single f32->bf16 cast per tile

        # ---- 'same' halo: zero ONLY the border, overwrite the interior ------
        xp_ref[0:1, :] = jnp.zeros((1, Wc * Cin), jnp.bfloat16)            # top
        xp_ref[H + 1:H + 2, :] = jnp.zeros((1, Wc * Cin), jnp.bfloat16)    # bottom
        xp_ref[:, W * Cin:Wc * Cin] = jnp.zeros((H + 2, Cin), jnp.bfloat16)  # right
        xp_ref[1:H + 1, 0:W * Cin] = a16          # lane-aligned interior store

        # ---- 3x3 conv = 3 MXU matmuls (one per dy), value accumulation ------
        acc = jnp.zeros((H, W * Cout), jnp.float32)
        for dy in range(3):                       # static unroll
            acc += jnp.dot(xp_ref[dy:dy + H, :], w_ref[dy],
                           preferred_element_type=jnp.float32)

        # ---- lane-dense stores: conv result + BN partial statistics ---------
        y_ref[0] = acc.astype(y_ref.dtype)
        psum_ref[0] = jnp.sum(acc, axis=0, keepdims=True)         # (1, W*Cout)
        pssq_ref[0] = jnp.sum(acc * acc, axis=0, keepdims=True)   # (1, W*Cout)

    return kernel


def fused_conv3x3(x_flat, w_hwio, scale, bias, *, W, apply_act, out_dtype):
    """[optional BN-affine+ReLU prologue] -> 3x3 'same' conv -> partial BN stats.

    x_flat : (N, H, W*Cin) lane-flattened activations (f32 or bf16)
    returns (y, psum, pssq):
      y    : (N, H, W*Cout) out_dtype, raw (pre-BN) conv output
      psum : (N, 1, W*Cout) f32, per-image column sums of y over H
      pssq : (N, 1, W*Cout) f32, per-image column sums of y*y over H
    """
    N, H, WC = x_flat.shape
    Cin = WC // W
    Cout = w_hwio.shape[-1]
    Wc = W + 1

    wb = _fold_weights(w_hwio.astype(jnp.float32), W).astype(jnp.bfloat16)
    s_t = jnp.tile(scale.astype(jnp.float32), W).reshape(1, W * Cin)
    b_t = jnp.tile(bias.astype(jnp.float32), W).reshape(1, W * Cin)

    out_shape = (
        jax.ShapeDtypeStruct((N, H, W * Cout), out_dtype),
        jax.ShapeDtypeStruct((N, 1, W * Cout), jnp.float32),
        jax.ShapeDtypeStruct((N, 1, W * Cout), jnp.float32),
    )
    return pl.pallas_call(
        _make_fused_conv_kernel(apply_act, H=H, W=W, Cin=Cin, Cout=Cout),
        out_shape=out_shape,
        grid_spec=pltpu.PrefetchScalarGridSpec(
            num_scalar_prefetch=0,
            grid=(N,),
            in_specs=[
                pl.BlockSpec((1, H, W * Cin), lambda n: (n, 0, 0)),
                pl.BlockSpec((3, Wc * Cin, W * Cout), lambda n: (0, 0, 0)),
                pl.BlockSpec((1, W * Cin), lambda n: (0, 0)),
                pl.BlockSpec((1, W * Cin), lambda n: (0, 0)),
            ],
            out_specs=[
                pl.BlockSpec((1, H, W * Cout), lambda n: (n, 0, 0)),
                pl.BlockSpec((1, 1, W * Cout), lambda n: (n, 0, 0)),
                pl.BlockSpec((1, 1, W * Cout), lambda n: (n, 0, 0)),
            ],
            scratch_shapes=[
                pltpu.VMEM((H + 2, Wc * Cin), jnp.bfloat16),   # halo tile
            ],
        ),
        compiler_params=pltpu.CompilerParams(
            dimension_semantics=("parallel",),
            vmem_limit_bytes=_vmem_limit_bytes(),
        ),
    )(x_flat, wb, s_t, b_t)


def _scale_bias_from_stats(psum, pssq, count, gamma, beta, C, eps=_EPS):
    """Fold per-image lane-dense partial sums into BN (scale, bias)."""
    n = psum.shape[0]
    s = jnp.sum(psum.reshape(n, -1, C), axis=(0, 1))
    q = jnp.sum(pssq.reshape(n, -1, C), axis=(0, 1))
    mean = s / count
    # Single-pass E[x^2]-E[x]^2 in f32: fine at these scales; for very large
    # N*H*W switch to per-tile centering / compensated accumulation.
    var = jnp.maximum(q / count - mean * mean, 0.0)       # biased batch variance
    scale = gamma * lax.rsqrt(var + eps)
    bias = beta - mean * scale
    return scale, bias


def double_conv(x_nchw, params):
    """DoubleConv forward (training-mode BN). x: (N,Cin,H,W) -> (N,Cout,H,W)."""
    w1, g1, b1, w2, g2, b2 = params
    N, Cin, H, W = x_nchw.shape
    Cmid, Cout = w1.shape[-1], w2.shape[-1]
    count = N * H * W

    # NCHW -> lane-flattened NHWC: (N, H, W*Cin)
    x = jnp.transpose(x_nchw, (0, 2, 3, 1)).reshape(N, H, W * Cin)
    x = x.astype(jnp.float32)

    # Block 1: conv on raw input; BN stats fall out of the same kernel.
    # y1 is stored bf16 (conv-2 feeds the MXU in bf16 anyway); stats stay f32.
    y1, ps1, pq1 = fused_conv3x3(
        x, w1, jnp.ones((Cin,), jnp.float32), jnp.zeros((Cin,), jnp.float32),
        W=W, apply_act=False, out_dtype=jnp.bfloat16)
    s1, t1 = _scale_bias_from_stats(ps1, pq1, count, g1, b1, Cmid)

    # Block 2: BN1 affine + ReLU fused as the prologue of the second conv.
    y2, ps2, pq2 = fused_conv3x3(
        y1, w2, s1, t1, W=W, apply_act=True, out_dtype=jnp.float32)
    s2, t2 = _scale_bias_from_stats(ps2, pq2, count, g2, b2, Cout)

    # Final BN affine + ReLU + layout restore: plain XLA (fuses elementwise +
    # transpose; per review this beats an extra Pallas read/write pass).
    out = jnp.maximum(y2 * jnp.tile(s2, W)[None, None, :]
                      + jnp.tile(t2, W)[None, None, :], 0.0)
    return out.reshape(N, H, W, Cout).transpose(0, 3, 1, 2)


# ----------------------------------------------------------------------------
# Pure-JAX reference (conv_dtype=bf16 matches the kernel's MXU precision;
# conv_dtype=f32 is the exact PyTorch-module semantics).
# ----------------------------------------------------------------------------
def _ref_block(a_nhwc, w, g, b, conv_dtype, eps=_EPS):
    y = lax.conv_general_dilated(
        a_nhwc.astype(conv_dtype), w.astype(conv_dtype),
        window_strides=(1, 1), padding="SAME",
        dimension_numbers=("NHWC", "HWIO", "NHWC"),
        preferred_element_type=jnp.float32)
    mean = jnp.mean(y, axis=(0, 1, 2))
    var = jnp.mean(jnp.square(y - mean), axis=(0, 1, 2))   # biased
    return jnp.maximum((y - mean) / jnp.sqrt(var + eps) * g + b, 0.0)


def double_conv_ref(x_nchw, params, conv_dtype=jnp.float32):
    w1, g1, b1, w2, g2, b2 = params
    x = jnp.transpose(x_nchw, (0, 2, 3, 1)).astype(jnp.float32)
    out = _ref_block(_ref_block(x, w1, g1, b1, conv_dtype),
                     w2, g2, b2, conv_dtype)
    return jnp.transpose(out, (0, 3, 1, 2))


# ----------------------------------------------------------------------------
if __name__ == "__main__":
    N, C_in, H, W = 2, 4, 16, 16
    C_mid = 8          # mid_channels defaults to out_channels
    C_out = 8

    key = jax.random.PRNGKey(0)
    kx, kw1, kg1, kb1, kw2, kg2, kb2 = jax.random.split(key, 7)

    x = jax.random.normal(kx, (N, C_in, H, W), dtype=jnp.float32)
    w1 = 0.1 * jax.random.normal(kw1, (3, 3, C_in, C_mid), dtype=jnp.float32)
    g1 = 1.0 + 0.1 * jax.random.normal(kg1, (C_mid,), dtype=jnp.float32)
    b1 = 0.1 * jax.random.normal(kb1, (C_mid,), dtype=jnp.float32)
    w2 = 0.1 * jax.random.normal(kw2, (3, 3, C_mid, C_out), dtype=jnp.float32)
    g2 = 1.0 + 0.1 * jax.random.normal(kg2, (C_out,), dtype=jnp.float32)
    b2 = 0.1 * jax.random.normal(kb2, (C_out,), dtype=jnp.float32)
    params = (w1, g1, b1, w2, g2, b2)

    out = jax.block_until_ready(jax.jit(double_conv)(x, params))
    assert out.shape == (N, C_out, H, W), out.shape

    # Apples-to-apples reference: bf16 conv inputs, f32 accumulation/BN stats.
    ref_bf16 = jax.block_until_ready(double_conv_ref(x, params, jnp.bfloat16))
    err_bf16 = float(jnp.max(jnp.abs(out - ref_bf16)))
    assert err_bf16 < 3e-2, f"bf16-matched reference mismatch: {err_bf16}"

    # Sanity bound vs. exact f32 PyTorch-module semantics (bf16 MXU inputs and
    # the bf16 y1 intermediate bound the deviation).
    ref_f32 = jax.block_until_ready(double_conv_ref(x, params, jnp.float32))
    err_f32 = float(jnp.max(jnp.abs(out - ref_f32)))
    assert err_f32 < 1e-1, f"f32 reference mismatch: {err_f32}"

    print("KERNEL_OK")
</pallas_src>

<mosaic_0001>
module attributes {stable_mosaic.version = 11 : i64} {
  func.func @kernel(%arg0: i32, %arg1: memref<1x16x64xf32, #tpu.memory_space<vmem>>, %arg2: memref<3x68x128xbf16, #tpu.memory_space<vmem>>, %arg3: memref<1x64xf32, #tpu.memory_space<vmem>>, %arg4: memref<1x64xf32, #tpu.memory_space<vmem>>, %arg5: memref<1x16x128xbf16, #tpu.memory_space<vmem>>, %arg6: memref<1x1x128xf32, #tpu.memory_space<vmem>>, %arg7: memref<1x1x128xf32, #tpu.memory_space<vmem>>, %arg8: memref<18x68xbf16, #tpu.memory_space<vmem>>) attributes {dimension_semantics = [#tpu.dimension_semantics<parallel>], iteration_bounds = array<i64: 2>, scalar_prefetch = 0 : i64, scratch_operands = 1 : i64, tpu.core_type = #tpu.core_type<tc>, window_params = [{transform_indices = @transform_0, window_bounds = array<i64: 1, 16, 64>}, {pipeline_mode = #tpu.pipeline_mode<synchronous>, transform_indices = @transform_1, window_bounds = array<i64: 3, 68, 128>}, {pipeline_mode = #tpu.pipeline_mode<synchronous>, transform_indices = @transform_2, window_bounds = array<i64: 1, 64>}, {pipeline_mode = #tpu.pipeline_mode<synchronous>, transform_indices = @transform_3, window_bounds = array<i64: 1, 64>}, {transform_indices = @transform_4, window_bounds = array<i64: 1, 16, 128>}, {transform_indices = @transform_5, window_bounds = array<i64: 1, 1, 128>}, {transform_indices = @transform_6, window_bounds = array<i64: 1, 1, 128>}]} {
    %c0 = arith.constant 0 : index
    %c0_0 = arith.constant 0 : index
    %c0_1 = arith.constant 0 : index
    %0 = vector.load %arg1[%c0, %c0_0, %c0_1] : memref<1x16x64xf32, #tpu.memory_space<vmem>>, vector<1x16x64xf32>
    %1 = vector.shape_cast %0 : vector<1x16x64xf32> to vector<16x64xf32>
    %2 = arith.truncf %1 : vector<16x64xf32> to vector<16x64xbf16>
    %cst = arith.constant 0.000000e+00 : bf16
    %3 = vector.broadcast %cst : bf16 to vector<1x68xbf16>
    %c0_2 = arith.constant 0 : index
    %c0_3 = arith.constant 0 : index
    %4 = vector.load %arg8[%c0_2, %c0_3] : memref<18x68xbf16, #tpu.memory_space<vmem>>, vector<1x68xbf16>
    tpu.vector_store %arg8[%c0_2, %c0_3], %3 {strides = array<i32>} : memref<18x68xbf16, #tpu.memory_space<vmem>>, vector<1x68xbf16>,
    %cst_4 = arith.constant 0.000000e+00 : bf16
    %5 = vector.broadcast %cst_4 : bf16 to vector<1x68xbf16>
    %c17 = arith.constant 17 : index
    %c0_5 = arith.constant 0 : index
    %6 = vector.load %arg8[%c17, %c0_5] : memref<18x68xbf16, #tpu.memory_space<vmem>>, vector<1x68xbf16>
    tpu.vector_store %arg8[%c17, %c0_5], %5 {strides = array<i32>} : memref<18x68xbf16, #tpu.memory_space<vmem>>, vector<1x68xbf16>,
    %cst_6 = arith.constant 0.000000e+00 : bf16
    %7 = vector.broadcast %cst_6 : bf16 to vector<18x4xbf16>
    %c0_7 = arith.constant 0 : index
    %c64 = arith.constant 64 : index
    %8 = vector.load %arg8[%c0_7, %c64] : memref<18x68xbf16, #tpu.memory_space<vmem>>, vector<18x4xbf16>
    tpu.vector_store %arg8[%c0_7, %c64], %7 {strides = array<i32>} : memref<18x68xbf16, #tpu.memory_space<vmem>>, vector<18x4xbf16>,
    %c1 = arith.constant 1 : index
    %c0_8 = arith.constant 0 : index
    %9 = vector.load %arg8[%c1, %c0_8] : memref<18x68xbf16, #tpu.memory_space<vmem>>, vector<16x64xbf16>
    tpu.vector_store %arg8[%c1, %c0_8], %2 {strides = array<i32>} : memref<18x68xbf16, #tpu.memory_space<vmem>>, vector<16x64xbf16>,
    %cst_9 = arith.constant 0.000000e+00 : f32
    %10 = vector.broadcast %cst_9 : f32 to vector<16x128xf32>
    %c0_10 = arith.constant 0 : index
    %c0_11 = arith.constant 0 : index
    %11 = vector.load %arg8[%c0_10, %c0_11] : memref<18x68xbf16, #tpu.memory_space<vmem>>, vector<16x68xbf16>
    %c0_12 = arith.constant 0 : index
    %c0_13 = arith.constant 0 : index
    %c0_14 = arith.constant 0 : index
    %12 = vector.load %arg2[%c0_12, %c0_13, %c0_14] : memref<3x68x128xbf16, #tpu.memory_space<vmem>>, vector<1x68x128xbf16>
    %13 = vector.shape_cast %12 : vector<1x68x128xbf16> to vector<68x128xbf16>
    %cst_15 = arith.constant dense<0.000000e+00> : vector<16x128xf32>
    %14 = tpu.matmul %11, %13, %cst_15 {dimension_numbers = #tpu.dot_dimension_numbers<[1], [0], [0], [1], [0, 0, 1, 1], [], []>} : vector<16x68xbf16>, vector<68x128xbf16>, vector<16x128xf32> -> vector<16x128xf32>
    %15 = arith.addf %10, %14 : vector<16x128xf32>
    %c1_16 = arith.constant 1 : index
    %c0_17 = arith.constant 0 : index
    %16 = vector.load %arg8[%c1_16, %c0_17] : memref<18x68xbf16, #tpu.memory_space<vmem>>, vector<16x68xbf16>
    %c1_18 = arith.constant 1 : index
    %c0_19 = arith.constant 0 : index
    %c0_20 = arith.constant 0 : index
    %17 = vector.load %arg2[%c1_18, %c0_19, %c0_20] : memref<3x68x128xbf16, #tpu.memory_space<vmem>>, vector<1x68x128xbf16>
    %18 = vector.shape_cast %17 : vector<1x68x128xbf16> to vector<68x128xbf16>
    %cst_21 = arith.constant dense<0.000000e+00> : vector<16x128xf32>
    %19 = tpu.matmul %16, %18, %cst_21 {dimension_numbers = #tpu.dot_dimension_numbers<[1], [0], [0], [1], [0, 0, 1, 1], [], []>} : vector<16x68xbf16>, vector<68x128xbf16>, vector<16x128xf32> -> vector<16x128xf32>
    %20 = arith.addf %15, %19 : vector<16x128xf32>
    %c2 = arith.constant 2 : index
    %c0_22 = arith.constant 0 : index
    %21 = vector.load %arg8[%c2, %c0_22] : memref<18x68xbf16, #tpu.memory_space<vmem>>, vector<16x68xbf16>
    %c2_23 = arith.constant 2 : index
    %c0_24 = arith.constant 0 : index
    %c0_25 = arith.constant 0 : index
    %22 = vector.load %arg2[%c2_23, %c0_24, %c0_25] : memref<3x68x128xbf16, #tpu.memory_space<vmem>>, vector<1x68x128xbf16>
    %23 = vector.shape_cast %22 : vector<1x68x128xbf16> to vector<68x128xbf16>
    %cst_26 = arith.constant dense<0.000000e+00> : vector<16x128xf32>
    %24 = tpu.matmul %21, %23, %cst_26 {dimension_numbers = #tpu.dot_dimension_numbers<[1], [0], [0], [1], [0, 0, 1, 1], [], []>} : vector<16x68xbf16>, vector<68x128xbf16>, vector<16x128xf32> -> vector<16x128xf32>
    %25 = arith.addf %20, %24 : vector<16x128xf32>
    %26 = arith.truncf %25 : vector<16x128xf32> to vector<16x128xbf16>
    %c0_27 = arith.constant 0 : index
    %c0_28 = arith.constant 0 : index
    %c0_29 = arith.constant 0 : index
    %27 = vector.load %arg5[%c0_27, %c0_28, %c0_29] : memref<1x16x128xbf16, #tpu.memory_space<vmem>>, vector<1x16x128xbf16>
    %28 = vector.shape_cast %27 : vector<1x16x128xbf16> to vector<16x128xbf16>
    %29 = vector.shape_cast %26 : vector<16x128xbf16> to vector<1x16x128xbf16>
    tpu.vector_store %arg5[%c0_27, %c0_28, %c0_29], %29 {strides = array<i32>} : memref<1x16x128xbf16, #tpu.memory_space<vmem>>, vector<1x16x128xbf16>,
    %cst_30 = arith.constant dense<0.000000e+00> : vector<128xf32>
    %30 = vector.multi_reduction <add>, %25, %cst_30 [0] : vector<16x128xf32> to vector<128xf32>
    %31 = vector.shape_cast %30 : vector<128xf32> to vector<1x128xf32>
    %c0_31 = arith.constant 0 : index
    %c0_32 = arith.constant 0 : index
    %c0_33 = arith.constant 0 : index
    %32 = vector.load %arg6[%c0_31, %c0_32, %c0_33] : memref<1x1x128xf32, #tpu.memory_space<vmem>>, vector<1x1x128xf32>
    %33 = vector.shape_cast %32 : vector<1x1x128xf32> to vector<1x128xf32>
    %34 = vector.shape_cast %31 : vector<1x128xf32> to vector<1x1x128xf32>
    tpu.vector_store %arg6[%c0_31, %c0_32, %c0_33], %34 {strides = array<i32>} : memref<1x1x128xf32, #tpu.memory_space<vmem>>, vector<1x1x128xf32>,
    %35 = arith.mulf %25, %25 : vector<16x128xf32>
    %cst_34 = arith.constant dense<0.000000e+00> : vector<128xf32>
    %36 = vector.multi_reduction <add>, %35, %cst_34 [0] : vector<16x128xf32> to vector<128xf32>
    %37 = vector.shape_cast %36 : vector<128xf32> to vector<1x128xf32>
    %c0_35 = arith.constant 0 : index
    %c0_36 = arith.constant 0 : index
    %c0_37 = arith.constant 0 : index
    %38 = vector.load %arg7[%c0_35, %c0_36, %c0_37] : memref<1x1x128xf32, #tpu.memory_space<vmem>>, vector<1x1x128xf32>
    %39 = vector.shape_cast %38 : vector<1x1x128xf32> to vector<1x128xf32>
    %40 = vector.shape_cast %37 : vector<1x128xf32> to vector<1x1x128xf32>
    tpu.vector_store %arg7[%c0_35, %c0_36, %c0_37], %40 {strides = array<i32>} : memref<1x1x128xf32, #tpu.memory_space<vmem>>, vector<1x1x128xf32>,
    return
  }
  func.func @transform_0(%arg0: i32) -> (i32, i32, i32) {
    %c0_i32 = arith.constant 0 : i32
    %c0_i32_0 = arith.constant 0 : i32
    %c0_i32_1 = arith.constant 0 : i32
    return %arg0, %c0_i32, %c0_i32_0 : i32, i32, i32
  }
  func.func @transform_1(%arg0: i32) -> (i32, i32, i32) {
    %c0_i32 = arith.constant 0 : i32
    %c0_i32_0 = arith.constant 0 : i32
    %c0_i32_1 = arith.constant 0 : i32
    %c0_i32_2 = arith.constant 0 : i32
    return %c0_i32, %c0_i32_0, %c0_i32_1 : i32, i32, i32
  }
  func.func @transform_2(%arg0: i32) -> (i32, i32) {
    %c0_i32 = arith.constant 0 : i32
    %c0_i32_0 = arith.constant 0 : i32
    %c0_i32_1 = arith.constant 0 : i32
    return %c0_i32, %c0_i32_0 : i32, i32
  }
  func.func @transform_3(%arg0: i32) -> (i32, i32) {
    %c0_i32 = arith.constant 0 : i32
    %c0_i32_0 = arith.constant 0 : i32
    %c0_i32_1 = arith.constant 0 : i32
    return %c0_i32, %c0_i32_0 : i32, i32
  }
  func.func @transform_4(%arg0: i32) -> (i32, i32, i32) {
    %c0_i32 = arith.constant 0 : i32
    %c0_i32_0 = arith.constant 0 : i32
    %c0_i32_1 = arith.constant 0 : i32
    return %arg0, %c0_i32, %c0_i32_0 : i32, i32, i32
  }
  func.func @transform_5(%arg0: i32) -> (i32, i32, i32) {
    %c0_i32 = arith.constant 0 : i32
    %c0_i32_0 = arith.constant 0 : i32
    %c0_i32_1 = arith.constant 0 : i32
    return %arg0, %c0_i32, %c0_i32_0 : i32, i32, i32
  }
  func.func @transform_6(%arg0: i32) -> (i32, i32, i32) {
    %c0_i32 = arith.constant 0 : i32
    %c0_i32_0 = arith.constant 0 : i32
    %c0_i32_1 = arith.constant 0 : i32
    return %arg0, %c0_i32, %c0_i32_0 : i32, i32, i32
  }
}

module attributes {stable_mosaic.version = 11 : i64} {
  func.func @kernel(%arg0: i32, %arg1: memref<1x16x128xbf16, #tpu.memory_space<vmem>>, %arg2: memref<3x136x128xbf16, #tpu.memory_space<vmem>>, %arg3: memref<1x128xf32, #tpu.memory_space<vmem>>, %arg4: memref<1x128xf32, #tpu.memory_space<vmem>>, %arg5: memref<1x16x128xf32, #tpu.memory_space<vmem>>, %arg6: memref<1x1x128xf32, #tpu.memory_space<vmem>>, %arg7: memref<1x1x128xf32, #tpu.memory_space<vmem>>, %arg8: memref<18x136xbf16, #tpu.memory_space<vmem>>) attributes {dimension_semantics = [#tpu.dimension_semantics<parallel>], iteration_bounds = array<i64: 2>, scalar_prefetch = 0 : i64, scratch_operands = 1 : i64, tpu.core_type = #tpu.core_type<tc>, window_params = [{transform_indices = @transform_0, window_bounds = array<i64: 1, 16, 128>}, {pipeline_mode = #tpu.pipeline_mode<synchronous>, transform_indices = @transform_1, window_bounds = array<i64: 3, 136, 128>}, {pipeline_mode = #tpu.pipeline_mode<synchronous>, transform_indices = @transform_2, window_bounds = array<i64: 1, 128>}, {pipeline_mode = #tpu.pipeline_mode<synchronous>, transform_indices = @transform_3, window_bounds = array<i64: 1, 128>}, {transform_indices = @transform_4, window_bounds = array<i64: 1, 16, 128>}, {transform_indices = @transform_5, window_bounds = array<i64: 1, 1, 128>}, {transform_indices = @transform_6, window_bounds = array<i64: 1, 1, 128>}]} {
    %c0 = arith.constant 0 : index
    %c0_0 = arith.constant 0 : index
    %c0_1 = arith.constant 0 : index
    %0 = vector.load %arg1[%c0, %c0_0, %c0_1] : memref<1x16x128xbf16, #tpu.memory_space<vmem>>, vector<1x16x128xbf16>
    %1 = vector.shape_cast %0 : vector<1x16x128xbf16> to vector<16x128xbf16>
    %2 = arith.extf %1 : vector<16x128xbf16> to vector<16x128xf32>
    %c0_2 = arith.constant 0 : index
    %c0_3 = arith.constant 0 : index
    %3 = vector.load %arg3[%c0_2, %c0_3] : memref<1x128xf32, #tpu.memory_space<vmem>>, vector<1x128xf32>
    %4 = vector.broadcast %3 : vector<1x128xf32> to vector<16x128xf32>
    %5 = arith.mulf %2, %4 : vector<16x128xf32>
    %c0_4 = arith.constant 0 : index
    %c0_5 = arith.constant 0 : index
    %6 = vector.load %arg4[%c0_4, %c0_5] : memref<1x128xf32, #tpu.memory_space<vmem>>, vector<1x128xf32>
    %7 = vector.broadcast %6 : vector<1x128xf32> to vector<16x128xf32>
    %8 = arith.addf %5, %7 : vector<16x128xf32>
    %cst = arith.constant 0.000000e+00 : f32
    %9 = vector.broadcast %cst : f32 to vector<16x128xf32>
    %10 = arith.maximumf %8, %9 : vector<16x128xf32>
    %11 = arith.truncf %10 : vector<16x128xf32> to vector<16x128xbf16>
    %cst_6 = arith.constant 0.000000e+00 : bf16
    %12 = vector.broadcast %cst_6 : bf16 to vector<1x136xbf16>
    %c0_7 = arith.constant 0 : index
    %c0_8 = arith.constant 0 : index
    %13 = vector.load %arg8[%c0_7, %c0_8] : memref<18x136xbf16, #tpu.memory_space<vmem>>, vector<1x136xbf16>
    tpu.vector_store %arg8[%c0_7, %c0_8], %12 {strides = array<i32>} : memref<18x136xbf16, #tpu.memory_space<vmem>>, vector<1x136xbf16>,
    %cst_9 = arith.constant 0.000000e+00 : bf16
    %14 = vector.broadcast %cst_9 : bf16 to vector<1x136xbf16>
    %c17 = arith.constant 17 : index
    %c0_10 = arith.constant 0 : index
    %15 = vector.load %arg8[%c17, %c0_10] : memref<18x136xbf16, #tpu.memory_space<vmem>>, vector<1x136xbf16>
    tpu.vector_store %arg8[%c17, %c0_10], %14 {strides = array<i32>} : memref<18x136xbf16, #tpu.memory_space<vmem>>, vector<1x136xbf16>,
    %cst_11 = arith.constant 0.000000e+00 : bf16
    %16 = vector.broadcast %cst_11 : bf16 to vector<18x8xbf16>
    %c0_12 = arith.constant 0 : index
    %c128 = arith.constant 128 : index
    %17 = vector.load %arg8[%c0_12, %c128] : memref<18x136xbf16, #tpu.memory_space<vmem>>, vector<18x8xbf16>
    tpu.vector_store %arg8[%c0_12, %c128], %16 {strides = array<i32>} : memref<18x136xbf16, #tpu.memory_space<vmem>>, vector<18x8xbf16>,
    %c1 = arith.constant 1 : index
    %c0_13 = arith.constant 0 : index
    %18 = vector.load %arg8[%c1, %c0_13] : memref<18x136xbf16, #tpu.memory_space<vmem>>, vector<16x128xbf16>
    tpu.vector_store %arg8[%c1, %c0_13], %11 {strides = array<i32>} : memref<18x136xbf16, #tpu.memory_space<vmem>>, vector<16x128xbf16>,
    %cst_14 = arith.constant 0.000000e+00 : f32
    %19 = vector.broadcast %cst_14 : f32 to vector<16x128xf32>
    %c0_15 = arith.constant 0 : index
    %c0_16 = arith.constant 0 : index
    %20 = vector.load %arg8[%c0_15, %c0_16] : memref<18x136xbf16, #tpu.memory_space<vmem>>, vector<16x136xbf16>
    %c0_17 = arith.constant 0 : index
    %c0_18 = arith.constant 0 : index
    %c0_19 = arith.constant 0 : index
    %21 = vector.load %arg2[%c0_17, %c0_18, %c0_19] : memref<3x136x128xbf16, #tpu.memory_space<vmem>>, vector<1x136x128xbf16>
    %22 = vector.shape_cast %21 : vector<1x136x128xbf16> to vector<136x128xbf16>
    %cst_20 = arith.constant dense<0.000000e+00> : vector<16x128xf32>
    %23 = tpu.matmul %20, %22, %cst_20 {dimension_numbers = #tpu.dot_dimension_numbers<[1], [0], [0], [1], [0, 0, 1, 1], [], []>} : vector<16x136xbf16>, vector<136x128xbf16>, vector<16x128xf32> -> vector<16x128xf32>
    %24 = arith.addf %19, %23 : vector<16x128xf32>
    %c1_21 = arith.constant 1 : index
    %c0_22 = arith.constant 0 : index
    %25 = vector.load %arg8[%c1_21, %c0_22] : memref<18x136xbf16, #tpu.memory_space<vmem>>, vector<16x136xbf16>
    %c1_23 = arith.constant 1 : index
    %c0_24 = arith.constant 0 : index
    %c0_25 = arith.constant 0 : index
    %26 = vector.load %arg2[%c1_23, %c0_24, %c0_25] : memref<3x136x128xbf16, #tpu.memory_space<vmem>>, vector<1x136x128xbf16>
    %27 = vector.shape_cast %26 : vector<1x136x128xbf16> to vector<136x128xbf16>
    %cst_26 = arith.constant dense<0.000000e+00> : vector<16x128xf32>
    %28 = tpu.matmul %25, %27, %cst_26 {dimension_numbers = #tpu.dot_dimension_numbers<[1], [0], [0], [1], [0, 0, 1, 1], [], []>} : vector<16x136xbf16>, vector<136x128xbf16>, vector<16x128xf32> -> vector<16x128xf32>
    %29 = arith.addf %24, %28 : vector<16x128xf32>
    %c2 = arith.constant 2 : index
    %c0_27 = arith.constant 0 : index
    %30 = vector.load %arg8[%c2, %c0_27] : memref<18x136xbf16, #tpu.memory_space<vmem>>, vector<16x136xbf16>
    %c2_28 = arith.constant 2 : index
    %c0_29 = arith.constant 0 : index
    %c0_30 = arith.constant 0 : index
    %31 = vector.load %arg2[%c2_28, %c0_29, %c0_30] : memref<3x136x128xbf16, #tpu.memory_space<vmem>>, vector<1x136x128xbf16>
    %32 = vector.shape_cast %31 : vector<1x136x128xbf16> to vector<136x128xbf16>
    %cst_31 = arith.constant dense<0.000000e+00> : vector<16x128xf32>
    %33 = tpu.matmul %30, %32, %cst_31 {dimension_numbers = #tpu.dot_dimension_numbers<[1], [0], [0], [1], [0, 0, 1, 1], [], []>} : vector<16x136xbf16>, vector<136x128xbf16>, vector<16x128xf32> -> vector<16x128xf32>
    %34 = arith.addf %29, %33 : vector<16x128xf32>
    %c0_32 = arith.constant 0 : index
    %c0_33 = arith.constant 0 : index
    %c0_34 = arith.constant 0 : index
    %35 = vector.load %arg5[%c0_32, %c0_33, %c0_34] : memref<1x16x128xf32, #tpu.memory_space<vmem>>, vector<1x16x128xf32>
    %36 = vector.shape_cast %35 : vector<1x16x128xf32> to vector<16x128xf32>
    %37 = vector.shape_cast %34 : vector<16x128xf32> to vector<1x16x128xf32>
    tpu.vector_store %arg5[%c0_32, %c0_33, %c0_34], %37 {strides = array<i32>} : memref<1x16x128xf32, #tpu.memory_space<vmem>>, vector<1x16x128xf32>,
    %cst_35 = arith.constant dense<0.000000e+00> : vector<128xf32>
    %38 = vector.multi_reduction <add>, %34, %cst_35 [0] : vector<16x128xf32> to vector<128xf32>
    %39 = vector.shape_cast %38 : vector<128xf32> to vector<1x128xf32>
    %c0_36 = arith.constant 0 : index
    %c0_37 = arith.constant 0 : index
    %c0_38 = arith.constant 0 : index
    %40 = vector.load %arg6[%c0_36, %c0_37, %c0_38] : memref<1x1x128xf32, #tpu.memory_space<vmem>>, vector<1x1x128xf32>
    %41 = vector.shape_cast %40 : vector<1x1x128xf32> to vector<1x128xf32>
    %42 = vector.shape_cast %39 : vector<1x128xf32> to vector<1x1x128xf32>
    tpu.vector_store %arg6[%c0_36, %c0_37, %c0_38], %42 {strides = array<i32>} : memref<1x1x128xf32, #tpu.memory_space<vmem>>, vector<1x1x128xf32>,
    %43 = arith.mulf %34, %34 : vector<16x128xf32>
    %cst_39 = arith.constant dense<0.000000e+00> : vector<128xf32>
    %44 = vector.multi_reduction <add>, %43, %cst_39 [0] : vector<16x128xf32> to vector<128xf32>
    %45 = vector.shape_cast %44 : vector<128xf32> to vector<1x128xf32>
    %c0_40 = arith.constant 0 : index
    %c0_41 = arith.constant 0 : index
    %c0_42 = arith.constant 0 : index
    %46 = vector.load %arg7[%c0_40, %c0_41, %c0_42] : memref<1x1x128xf32, #tpu.memory_space<vmem>>, vector<1x1x128xf32>
    %47 = vector.shape_cast %46 : vector<1x1x128xf32> to vector<1x128xf32>
    %48 = vector.shape_cast %45 : vector<1x128xf32> to vector<1x1x128xf32>
    tpu.vector_store %arg7[%c0_40, %c0_41, %c0_42], %48 {strides = array<i32>} : memref<1x1x128xf32, #tpu.memory_space<vmem>>, vector<1x1x128xf32>,
    return
  }
  func.func @transform_0(%arg0: i32) -> (i32, i32, i32) {
    %c0_i32 = arith.constant 0 : i32
    %c0_i32_0 = arith.constant 0 : i32
    %c0_i32_1 = arith.constant 0 : i32
    return %arg0, %c0_i32, %c0_i32_0 : i32, i32, i32
  }
  func.func @transform_1(%arg0: i32) -> (i32, i32, i32) {
    %c0_i32 = arith.constant 0 : i32
    %c0_i32_0 = arith.constant 0 : i32
    %c0_i32_1 = arith.constant 0 : i32
    %c0_i32_2 = arith.constant 0 : i32
    return %c0_i32, %c0_i32_0, %c0_i32_1 : i32, i32, i32
  }
  func.func @transform_2(%arg0: i32) -> (i32, i32) {
    %c0_i32 = arith.constant 0 : i32
    %c0_i32_0 = arith.constant 0 : i32
    %c0_i32_1 = arith.constant 0 : i32
    return %c0_i32, %c0_i32_0 : i32, i32
  }
  func.func @transform_3(%arg0: i32) -> (i32, i32) {
    %c0_i32 = arith.constant 0 : i32
    %c0_i32_0 = arith.constant 0 : i32
    %c0_i32_1 = arith.constant 0 : i32
    return %c0_i32, %c0_i32_0 : i32, i32
  }
  func.func @transform_4(%arg0: i32) -> (i32, i32, i32) {
    %c0_i32 = arith.constant 0 : i32
    %c0_i32_0 = arith.constant 0 : i32
    %c0_i32_1 = arith.constant 0 : i32
    return %arg0, %c0_i32, %c0_i32_0 : i32, i32, i32
  }
  func.func @transform_5(%arg0: i32) -> (i32, i32, i32) {
    %c0_i32 = arith.constant 0 : i32
    %c0_i32_0 = arith.constant 0 : i32
    %c0_i32_1 = arith.constant 0 : i32
    return %arg0, %c0_i32, %c0_i32_0 : i32, i32, i32
  }
  func.func @transform_6(%arg0: i32) -> (i32, i32, i32) {
    %c0_i32 = arith.constant 0 : i32
    %c0_i32_0 = arith.constant 0 : i32
    %c0_i32_1 = arith.constant 0 : i32
    return %arg0, %c0_i32, %c0_i32_0 : i32, i32, i32
  }
}

</mosaic_0001>

<bundles_post_ra>
// kernel: tile.22
= control target key start
LH: loop header
LB: loop body
LE: loop exit
PB: predicated region body
PF: predicated region fallthrough
CT: control target
= control target key end

     0   :  { %s20_s0 = inlined_call_operand.<no memory space> [shape: f32[], index: 0, kind: input, shape index: {}]   ;;  %s21_s1 = inlined_call_operand.vmem [shape: f32[1,64], index: 1, kind: output, shape index: {}]  }
   0x1   :  { %v2_v0 = vstv %s20_s0 }
   0x2   :  { %3 = vst [vmem:[%s21_s1] sm:$0x1] %v2_v0 }

// kernel: tile.32
= control target key start
LH: loop header
LB: loop body
LE: loop exit
PB: predicated region body
PF: predicated region fallthrough
CT: control target
= control target key end

     0   :  { %s28_s0 = inlined_call_operand.vmem [shape: f32[8], index: 0, kind: input, shape index: {}]   ;;  %s29_s1 = inlined_call_operand.vmem [shape: f32[16,8], index: 1, kind: output, shape index: {}]  }
   0x1   :  { %v4_v0 = vld [vmem:[%s28_s0] ss:$0 sm:$0xff] }
   0x2   :  { %5 = vst [vmem:[%s29_s1] sm:$0xff] %v4_v0  ;;  %8 = vst [vmem:[%s29_s1 + $0x8] sm:$0xff] %v4_v0 }

// kernel: tile.33
= control target key start
LH: loop header
LB: loop body
LE: loop exit
PB: predicated region body
PF: predicated region fallthrough
CT: control target
= control target key end

     0   :  { %s131_s10 = smov 120   ;;  %s132_s11 = smov 104   ;;  %vm3_vm0 = vcmask 64512   ;;  %vm9_vm1 = vcmask 1048512   ;;  %vm15_vm2 = vcmask 982912   ;;  %vm21_vm3 = vcmask 917312   ;;  %s207_s0 = inlined_call_operand.vmem [shape: f32[16,8], index: 0, kind: input, shape index: {}]   ;;  %s208_s1 = inlined_call_operand.vmem [shape: f32[1,128], index: 1, kind: output, shape index: {}]  }
   0x1   :  { %v101_v0 = vld [vmem:[%s207_s0 + $0xf] sm:$0x1]   ;;  %v103_v1 = vld [vmem:[%s207_s0 + $0xd] sm:$0x1]   ;;  %v102_v2 = vld [vmem:[%s207_s0 + $0xe] sm:$0x1]  }
   0x2   :  { %7 = vrot.lane.b32.xlu0 %v101_v0, %s131_s10  ;;  %19 = vrot.lane.b32.xlu1 %v103_v1, %s132_s11  ;;  %v104_v3 = vld [vmem:[%s207_s0 + $0xc] sm:$0x1]   ;;  %s133_s16 = smov 112   ;;  %s134_s17 = smov 96   ;;  %v105_v4 = vld [vmem:[%s207_s0 + $0xb] sm:$0x1]  }
   0x3   :  { %v106_v5 = vld [vmem:[%s207_s0 + $0xa] sm:$0x1]   ;;  %v2_v6 = vld [vmem:[%s207_s0] sm:$0x1]   ;;  %s135_s24 = smov 88   ;;  %s136_s25 = smov 80  }
   0x4   :  { %4 = vst.msk [vmem:[#allocation0] sm:$0x1] %vm3_vm0, %v2_v6   ;;  %v107_v7 = vld [vmem:[%s207_s0 + $0x9] sm:$0x1]   ;;  %v108_v8 = vld [vmem:[%s207_s0 + $0x8] sm:$0x1]  }
   0x5   :  { %s137_s30 = smov 72   ;;  %s138_s2 = smov 64   ;;  %v109_v9 = vld [vmem:[%s207_s0 + $0x7] sm:$0x1]   ;;  %v110_v10 = vld [vmem:[%s207_s0 + $0x6] sm:$0x1]  }
   0x6   :  { %13 = vrot.lane.b32.xlu0 %v102_v2, %s133_s16  ;;  %25 = vrot.lane.b32.xlu1 %v104_v3, %s134_s17  ;;  %s139_s7 = smov 56   ;;  %s140_s8 = smov 48   ;;  %v111_v11 = vld [vmem:[%s207_s0 + $0x5] sm:$0x1]   ;;  %v112_v12 = vld [vmem:[%s207_s0 + $0x4] sm:$0x1]  }
   0x7   :  { %s141_s13 = smov 40   ;;  %s142_s14 = smov 32   ;;  %v113_v13 = vld [vmem:[%s207_s0 + $0x3] sm:$0x1]   ;;  %v114_v14 = vld [vmem:[%s207_s0 + $0x2] sm:$0x1]  }
   0x8   :  { %s143_s19 = smov 24   ;;  %s144_s20 = smov 16   ;;  %v115_v15 = vld [vmem:[%s207_s0 + $0x1] sm:$0x1]   ;;  %vm27_vm4 = vcmask 851712   ;;  %vm33_vm5 = vcmask 786112  }
   0x9   :  { %s145_s0 = smov 8   ;;  %vm39_vm6 = vcmask 720512   ;;  %vm45_vm7 = vcmask 654912   ;;  %vm51_vm8 = vcmask 589312   ;;  %vm57_vm9 = vcmask 523712  }
   0xa   :  { %31 = vrot.lane.b32.xlu0 %v105_v4, %s135_s24  ;;  %37 = vrot.lane.b32.xlu1 %v106_v5, %s136_s25  ;;  %vm63_vm10 = vcmask 458112   ;;  %vm69_vm11 = vcmask 392512   ;;  %vm75_vm12 = vcmask 326912   ;;  %vm81_vm13 = vcmask 261312  }
   0xb   :  { %vm87_vm14 = vcmask 195712   ;;  %vm93_vm15 = vcmask 130112  }
   0xe   :  { %43 = vrot.lane.b32.xlu0 %v107_v7, %s137_s30  ;;  %49 = vrot.lane.b32.xlu1 %v108_v8, %s138_s2 }
  0x12   :  { %55 = vrot.lane.b32.xlu0 %v109_v9, %s139_s7  ;;  %61 = vrot.lane.b32.xlu1 %v110_v10, %s140_s8 }
  0x16   :  { %67 = vrot.lane.b32.xlu0 %v111_v11, %s141_s13  ;;  %73 = vrot.lane.b32.xlu1 %v112_v12, %s142_s14 }
  0x1a   :  { %79 = vrot.lane.b32.xlu0 %v113_v13, %s143_s19  ;;  %85 = vrot.lane.b32.xlu1 %v114_v14, %s144_s20 }
  0x1e   :  { %91 = vrot.lane.b32.xlu0 %v115_v15, %s145_s0 }
  0x74   :  { %v8_v16 = vpop.permute.xlu0 %7   ;;  %v20_v17 = vpop.permute.xlu1 %19  }
  0x75   :  { %10 = vst.msk [vmem:[#allocation0] sm:$0x1] %vm9_vm1, %v8_v16  }
  0x78   :  { %v14_v18 = vpop.permute.xlu0 %13   ;;  %v26_v19 = vpop.permute.xlu1 %25  }
  0x79   :  { %16 = vst.msk [vmem:[#allocation0] sm:$0x1] %vm15_vm2, %v14_v18  }
  0x7a   :  { %22 = vst.msk [vmem:[#allocation0] sm:$0x1] %vm21_vm3, %v20_v17  }
  0x7b   :  { %28 = vst.msk [vmem:[#allocation0] sm:$0x1] %vm27_vm4, %v26_v19  }
  0x7c   :  { %v32_v20 = vpop.permute.xlu0 %31   ;;  %v38_v21 = vpop.permute.xlu1 %37  }
  0x7d   :  { %34 = vst.msk [vmem:[#allocation0] sm:$0x1] %vm33_vm5, %v32_v20  }
  0x7e   :  { %40 = vst.msk [vmem:[#allocation0] sm:$0x1] %vm39_vm6, %v38_v21  }
  0x80   :  { %v44_v22 = vpop.permute.xlu0 %43   ;;  %v50_v23 = vpop.permute.xlu1 %49  }
  0x81   :  { %46 = vst.msk [vmem:[#allocation0] sm:$0x1] %vm45_vm7, %v44_v22  }
  0x82   :  { %52 = vst.msk [vmem:[#allocation0] sm:$0x1] %vm51_vm8, %v50_v23  }
  0x84   :  { %v56_v24 = vpop.permute.xlu0 %55   ;;  %v62_v25 = vpop.permute.xlu1 %61  }
  0x85   :  { %58 = vst.msk [vmem:[#allocation0] sm:$0x1] %vm57_vm9, %v56_v24  }
  0x86   :  { %64 = vst.msk [vmem:[#allocation0] sm:$0x1] %vm63_vm10, %v62_v25  }
  0x88   :  { %v68_v26 = vpop.permute.xlu0 %67   ;;  %v74_v27 = vpop.permute.xlu1 %73  }
  0x89   :  { %70 = vst.msk [vmem:[#allocation0] sm:$0x1] %vm69_vm11, %v68_v26  }
  0x8a   :  { %76 = vst.msk [vmem:[#allocation0] sm:$0x1] %vm75_vm12, %v74_v27  }
  0x8c   :  { %v80_v28 = vpop.permute.xlu0 %79   ;;  %v86_v29 = vpop.permute.xlu1 %85  }
  0x8d   :  { %82 = vst.msk [vmem:[#allocation0] sm:$0x1] %vm81_vm13, %v80_v28  }
  0x8e   :  { %88 = vst.msk [vmem:[#allocation0] sm:$0x1] %vm87_vm14, %v86_v29  }
  0x90   :  { %v92_v30 = vpop.permute.xlu0 %91  }
  0x91   :  { %94 = vst.msk [vmem:[#allocation0] sm:$0x1] %vm93_vm15, %v92_v30  }
  0x98   :  { %v98_v31 = vld [vmem:[#allocation0] sm:$0x1] }
  0x99   :  { %100 = vst [vmem:[%s208_s1] sm:$0x1] %v98_v31 }

// kernel: double_conv.2
= control target key start
LH: loop header
LB: loop body
LE: loop exit
PB: predicated region body
PF: predicated region fallthrough
CT: control target
= control target key end

     0   :  { %s953_s21 = smov 0   ;;  %s1077_s0 = inlined_call_operand.vmem [shape: f32[2,16,64], index: 0, kind: input, shape index: {}]   ;;  %s1078_s1 = inlined_call_operand.vmem [shape: bf16[3,68,128], index: 1, kind: input, shape index: {}]   ;;  %s1079_s2 = inlined_call_operand.vmem [shape: f32[1,64], index: 2, kind: input, shape index: {}]   ;;  %s1080_s3 = inlined_call_operand.vmem [shape: f32[1,64], index: 3, kind: input, shape index: {}]   ;;  %s1081_s4 = inlined_call_operand.vmem [shape: bf16[2,16,128], index: 4, kind: output, shape index: {0}]   ;;  %s1082_s5 = inlined_call_operand.vmem [shape: f32[2,1,128], index: 5, kind: output, shape index: {1}]   ;;  %s1083_s6 = inlined_call_operand.vmem [shape: f32[2,1,128], index: 6, kind: output, shape index: {2}]  }
   0x1 LB: > { %s747_s2 = sadd.s32 4294967295, %s913_s21   ;;  %p751_p0 = scmp.ge.s32.totalorder %s913_s21, 1  ;;  %s913_s21 = sphi %s953_s21, %s17_s21  }
   0x2   : > { %p217_p1 = scmp.lt.s32.totalorder %s913_s21, 3 }
   0x4   : > { %p218_p2 = pnand %p751_p0, %p217_p1 }
   0x5   : > { %v889_v0 = vld [vmem:[%s1078_s1] sm:$0xff] (!%p218_p2)   ;;  %v915_v1 = vmov (!%p218_p2), 0.0   ;;  %v890_v2 = vld [vmem:[%s1078_s1 + $0x8] sm:$0xff] (!%p218_p2)   ;;  %vm916_vm0 = vmmov (!%p218_p2), 0   ;;  %p253_p3 = scmp.lt.s32.totalorder (!%p218_p2), %s747_s2, 1  ;;  %vm273_vm1 = vcmask (!%p218_p2), 548864  }
   0x6   : > { %221 = sbr.rel (%p218_p2) target bundleno = 289 (0x121), region = 36  ;;  %844 = vmatprep.subr.bf16.mxu0 (!%p218_p2), %v915_v1  ;;  %830 = vmatprep.subr.bf16.mxu1 (!%p218_p2), %v915_v1  ;;  %v894_v3 = vld [vmem:[%s1078_s1 + $0x24] sm:$0xff] (!%p218_p2)   ;;  %v891_v4 = vld [vmem:[%s1078_s1 + $0x10] sm:$0xff] (!%p218_p2)   ;;  %vm274_vm2 = vsmask.f32 (!%p218_p2), 256  ;;  %vm284_vm3 = vcmask (!%p218_p2), 552448  }
   0x7   : > { %845 = vmatpush3.bf16.msra.mxu0 (!%p218_p2), %v889_v0  ;;  %854 = vmatprep.mubr.msk.bf16.mxu0 (!%p218_p2), %vm916_vm0, %v915_v1  ;;  %v276_v5 = vld [vmem:[#allocation2] sm:$0x1] (!%p218_p2)  ;;  %vm275_vm4 = vmand (!%p218_p2), %vm273_vm1, %vm274_vm2  ;;  %vm279_vm5 = vsmask.f32 (!%p218_p2), 7938  ;;  %v281_v6 = vld [vmem:[#allocation2 + $0x8] sm:$0x1] (!%p218_p2) }
   0x8   : > { %846 = vmatprep.subr.bf16.mxu0 (!%p218_p2), %v915_v1  ;;  %840 = vmatprep.mubr.msk.bf16.mxu1 (!%p218_p2), %vm916_vm0, %v915_v1  ;;  %v893_v7 = vld [vmem:[%s1078_s1 + $0x20] ss:$0 sps:$4 sm:$0x33] (!%p218_p2)   ;;  %v277_v8 = vsel (!%p218_p2), %vm275_vm4, 0, %v276_v5  ;;  %vm280_vm6 = vmand (!%p218_p2), %vm273_vm1, %vm279_vm5  ;;  %v917_v9 = vmov (!%p218_p2), 0   ;;  %v892_v10 = vld [vmem:[%s1078_s1 + $0x18] sm:$0xff] (!%p218_p2)  }
   0x9   : > { %831 = vmatpush3.bf16.msra.mxu1 (!%p218_p2), %v894_v3  ;;  %286 = vst.msk [vmem:[#allocation2 + $0x4] sm:$0xf] (!%p218_p2), %vm284_vm3, %v917_v9  ;;  %vm402_vm7 = vcmask (!%p218_p2), 1041408   ;;  %278 = vst [vmem:[#allocation2] sm:$0x1] (!%p218_p2), %v277_v8  ;;  %v282_v13 = vsel (!%p218_p2), %vm280_vm6, 0, %v281_v6 }
   0xa   : > { %832 = vmatprep.subr.bf16.mxu1 (!%p218_p2), %v915_v1  ;;  %vm287_vm8 = vcmask (!%p218_p2), 549376   ;;  %283 = vst [vmem:[#allocation2 + $0x8] sm:$0x1] (!%p218_p2), %v282_v13  ;;  %285 = vst.msk [vmem:[#allocation2] sm:$0xf] (!%p218_p2), %vm284_vm3, %v917_v9  ;;  %vm316_vm10 = vcmask (!%p218_p2), 519168  }
   0xb   : > { %847 = vmatpush3.bf16.msra.mxu0 (!%p218_p2), %v890_v2  ;;  %vm294_vm9 = vsmask.f32 (!%p218_p2), 4368  ;;  %v898_v16 = vld [vmem:[%s1078_s1 + $0x2c] sm:$0xff] (!%p218_p2)   ;;  %288 = vst.msk [vmem:[#allocation2 + $0x8] sm:$0x1] (!%p218_p2), %vm287_vm8, %v917_v9  ;;  %vm323_vm12 = vcmask (!%p218_p2), 516096   ;;  %vm1012_vm13 = vmand (!%p218_p2), %vm316_vm10, %vm279_vm5 }
   0xc   : > { %848 = vmatprep.subr.bf16.mxu0 (!%p218_p2), %v915_v1  ;;  %vm1005_vm11 = vmor (!%p218_p2), %vm274_vm2, %vm294_vm9  ;;  %v477_v22 = vsel (!%p218_p2), %vm402_vm7, %v893_v7, 0  ;;  %v900_v26 = vld [vmem:[%s1078_s1 + $0x34] sm:$0xff] (!%p218_p2)   ;;  %v902_v31 = vld [vmem:[%s1078_s1 + $0x3c] sm:$0xff] (!%p218_p2)   ;;  %vm398_vm15 = vcmask (!%p218_p2), 556032   ;;  %vm358_vm1 = vsmask.f32 (!%p218_p2), 7424 }
   0xd   : > { %s1089_s2 = smov (!%p253_p3, %s747_s2), 1  ;;  %833 = vmatpush3.bf16.msra.mxu1 %v898_v16  ;;  %vm324_vm14 = vmand %vm323_vm12, %vm274_vm2  ;;  %v904_v35 = vld [vmem:[%s1078_s1 + $0x44] ss:$0 sps:$4 sm:$0x33]   ;;  %v897_v41 = vld [vmem:[%s1078_s1 + $0x48] sm:$0xff]  }
   0xe   : > { %s801_s29 = sshll.u32 %s1089_s2, 4  ;;  %834 = vmatprep.subr.bf16.mxu1 %v915_v1  ;;  %v404_v38 = vsel %vm402_vm7, %v904_v35, 0  ;;  %v899_v46 = vld [vmem:[%s1078_s1 + $0x50] sm:$0xff]   ;;  %v901_v51 = vld [vmem:[%s1078_s1 + $0x58] sm:$0xff]   ;;  %v903_v55 = vld [vmem:[%s1078_s1 + $0x60] sm:$0xff]   ;;  %s802_s7 = sshll.u32 %s1089_s2, 3 }
   0xf   : > { %s257_s10 = scalar_lea.vmem %s1077_s0, %s801_s29  ;;  %849 = vmatpush3.bf16.msra.mxu0 %v891_v4  ;;  %v906_v56 = vld [vmem:[%s1078_s1 + $0x68] ss:$0 sps:$4 sm:$0x33]   ;;  %s265_s13 = scalar_lea.vmem %s1082_s5, %s1089_s2 }
  0x10   : > { %v270_v11 = vld [vmem:[%s257_s10] sm:$0xff]  ;;  %v271_v12 = vld [vmem:[%s257_s10 + $0x8] sm:$0xff]  ;;  %850 = vmatprep.subr.bf16.mxu0 %v915_v1  ;;  %v569_v59 = vsel %vm402_vm7, %v906_v56, 0  ;;  %s262_s10 = scalar_lea.vmem %s1081_s4, %s802_s7  ;;  %s268_s16 = scalar_lea.vmem %s1083_s6, %s1089_s2 }
  0x11   : > { %v803_v14 = vpack.c.bf16 %v270_v11, %v270_v11  ;;  %v804_v15 = vpack.c.bf16 %v271_v12, %v271_v12  ;;  %v318_v30 = vld [vmem:[#allocation2] sm:$0xf]  ;;  %835 = vmatpush3.bf16.msra.mxu1 %v900_v26 }
  0x12   : > { %836 = vmatprep.subr.bf16.mxu1 %v915_v1  ;;  %v325_v36 = vld [vmem:[#allocation2 + $0x8] sm:$0x1] }
  0x13   : > { %v297_v17 = vshrl.u32 %v803_v14, 16  ;;  %v300_v18 = vshll.u32 %v803_v14, 16  ;;  %v305_v19 = vshrl.u32 %v804_v15, 16  ;;  %v308_v20 = vshll.u32 %v804_v15, 16  ;;  %851 = vmatpush3.bf16.msra.mxu0 %v892_v10 }
  0x14   : > { %852 = vmatprep.subr.bf16.mxu0 %v915_v1 }
  0x15   : > { %v299_v23 = vrot.slane %v297_v17, 7  ;;  %v307_v24 = vrot.slane %v305_v19, 7  ;;  %837 = vmatpush3.bf16.msra.mxu1 %v902_v31 }
  0x16   : > { %838 = vmatprep.subr.bf16.mxu1 %v915_v1 }
  0x17   : > { %v302_v27 = vor.u32 %v300_v18, %v299_v23  ;;  %v303_v28 = vrot.slane %v299_v23, 4  ;;  %v310_v29 = vor.u32 %v308_v20, %v307_v24  ;;  %v312_v32 = vrot.slane %v307_v24, 4  ;;  %853 = vmatpush3.bf16.msra.mxu0 %v477_v22 }
  0x18   : > { %858 = vmatprep.subr.bf16.mxu0 %v915_v1 }
  0x19   : > { %v311_v33 = vsel %vm1005_vm11, %v303_v28, %v310_v29  ;;  %v319_v34 = vsel %vm1012_vm13, %v302_v27, %v318_v30  ;;  %v326_v37 = vsel %vm324_vm14, %v312_v32, %v325_v36  ;;  %839 = vmatpush3.bf16.msra.mxu1 %v404_v38 }
  0x1a   : > { %320 = vst [vmem:[#allocation2] sm:$0xf] %v319_v34  ;;  %322 = vst.msk [vmem:[#allocation2 + $0x4] sm:$0xf] %vm316_vm10, %v311_v33 }
  0x1b   : > { %327 = vst [vmem:[#allocation2 + $0x8] sm:$0x1] %v326_v37 }
  0x21   : > { %v328_v39 = vld [vmem:[#allocation2] sm:$0xf]  ;;  %v329_v40 = vld [vmem:[#allocation2 + $0x4] sm:$0xf] }
  0x22   : > { %v767_v42 = vcombine.low %v328_v39, %v329_v40  ;;  %v905_v43 = vld [vmem:[#allocation2 + $0x8] ss:$0 sps:$4 sm:$0x11]   ;;  %v520_v52 = vld [vmem:[#allocation2] sm:$0xe] }
  0x23   : > { %v367_v47 = vshll.u32 %v905_v43, 16  ;;  %v790_v54 = vcombine.low %v520_v52, %v329_v40  ;;  %v536_v58 = vrot.slane %v905_v43, 1 }
  0x24   : > { %855 = vmatmul.mubr.msk.bf16.vlgmr.msra.gmra.mrb[0].mxu0 %vm398_vm15, %v767_v42  ;;  %v360_v44 = vshrl.u32 %v767_v42, 16  ;;  %v362_v45 = vshll.u32 %v767_v42, 16 }
  0x25   : > { %859 = vmatpush3.bf16.msra.mxu0 %v897_v41  ;;  %868 = vmatprep.mubr.msk.bf16.mxu0 %vm916_vm0, %v915_v1  ;;  %v369_v49 = vrot.slane %v367_v47, 1  ;;  %v535_v57 = vrot.slane %v790_v54, 1  ;;  %vm534_vm0 = vcmask 1046528  }
  0x26   : > { %860 = vmatprep.subr.bf16.mxu0 %v915_v1  ;;  %v364_v48 = vrot.slane %v362_v45, 1 }
  0x27   : > { %v537_v60 = vsel %vm534_vm0, %v535_v57, %v536_v58 }
  0x28   : > { %v365_v50 = vor.u32 %v364_v48, %v360_v44 }
  0x29   : > { %861 = vmatpush3.bf16.msra.mxu0 %v899_v46 }
  0x2a   : > { %862 = vmatprep.subr.bf16.mxu0 %v915_v1  ;;  %v370_v53 = vsel %vm358_vm1, %v365_v50, %v369_v49 }
  0x2b   : > { %841 = vmatmul.mubr.msk.bf16.vlgmr.msra.gmra.mrb[0].mxu1 %vm398_vm15, %v370_v53 }
  0x2d   : > { %863 = vmatpush3.bf16.msra.mxu0 %v901_v51 }
  0x2e   : > { %864 = vmatprep.subr.bf16.mxu0 %v915_v1 }
  0x31   : > { %865 = vmatpush3.bf16.msra.mxu0 %v903_v55 }
  0x32   : > { %866 = vmatprep.subr.bf16.mxu0 %v915_v1 }
  0x35   : > { %867 = vmatpush3.bf16.msra.mxu0 %v569_v59 }
  0x38   : > { %869 = vmatmul.mubr.msk.bf16.vlgmr.msra.gmra.mrb[0].mxu0 %vm398_vm15, %v537_v60 }
  0xfe   : > { %v440_v61 = vpop.f32.mrb[0].mxu1 }
  0xff   : > { %v842_v62 = vpop.f32.mrb[1].mxu1 }
 0x100   : > { %v443_v63 = vpop.f32.mrb[2].mxu1 }
 0x101   : > { %v843_v0 = vpop.f32.mrb[3].mxu1 }
 0x10b   : > { %v605_v2 = vpop.f32.mrb[0].mxu0 }
 0x10c   : > { %v872_v3 = vadd.f32 %v605_v2, %v440_v61  ;;  %v870_v4 = vpop.f32.mrb[1].mxu0 }
 0x10d   : > { %v608_v5 = vpop.f32.mrb[2].mxu0 }
 0x10e   : > { %v873_v6 = vadd.f32 %v608_v5, %v443_v63  ;;  %v871_v7 = vpop.f32.mrb[3].mxu0  ;;  %v632_v1 = vmul.f32 %v872_v3, %v872_v3 }
 0x110   : > { %v810_v8 = vpack.c.bf16 %v873_v6, %v872_v3  ;;  %v624_v9 = vadd.f32 %v873_v6, %v872_v3  ;;  %v633_v10 = vmul.f32 %v873_v6, %v873_v6 }
 0x112   : > { %811 = vst [vmem:[%s262_s10] sm:$0xff] %v810_v8   ;;  %v625_v11 = vrot.slane %v624_v9, 4  ;;  %v634_v12 = vadd.f32 %v633_v10, %v632_v1 }
 0x114   : > { %v626_v13 = vadd.f32 %v625_v11, %v624_v9  ;;  %v635_v14 = vrot.slane %v634_v12, 4 }
 0x116   : > { %v627_v15 = vrot.slane %v626_v13, 2  ;;  %v636_v16 = vadd.f32 %v635_v14, %v634_v12 }
 0x118   : > { %v628_v17 = vadd.f32 %v627_v15, %v626_v13  ;;  %v637_v18 = vrot.slane %v636_v16, 2 }
 0x11a   : > { %v629_v19 = vrot.slane %v628_v17, 1  ;;  %v638_v20 = vadd.f32 %v637_v18, %v636_v16 }
 0x11c   : > { %v630_v21 = vadd.f32 %v629_v19, %v628_v17  ;;  %v639_v22 = vrot.slane %v638_v20, 1 }
 0x11e   : > { %631 = vst [vmem:[%s265_s13] sm:$0x1] %v630_v21  ;;  %v640_v23 = vadd.f32 %v639_v22, %v638_v20 }
 0x120   : > { %641 = vst [vmem:[%s268_s16] sm:$0x1] %v640_v23 }
 0x121 PF: > { %s17_s21 = sadd.s32 1, %s913_s21  }
 0x122   : > { %p14_p4 = scmp.ge.s32.totalorder %s17_s21, 4  }
 0x124   :  { %16 = sbr.rel (!%p14_p4) target bundleno = 1 (0x1), region = 92 }

// kernel: double_conv.3
= control target key start
LH: loop header
LB: loop body
LE: loop exit
PB: predicated region body
PF: predicated region fallthrough
CT: control target
= control target key end

     0   :  { %s1071_s21 = smov 0   ;;  %s1273_s0 = inlined_call_operand.vmem [shape: bf16[2,16,128], index: 0, kind: input, shape index: {}]   ;;  %s1274_s1 = inlined_call_operand.vmem [shape: bf16[3,136,128], index: 1, kind: input, shape index: {}]   ;;  %s1275_s2 = inlined_call_operand.vmem [shape: f32[1,128], index: 2, kind: input, shape index: {}]   ;;  %s1276_s3 = inlined_call_operand.vmem [shape: f32[1,128], index: 3, kind: input, shape index: {}]   ;;  %s1277_s4 = inlined_call_operand.vmem [shape: f32[2,16,128], index: 4, kind: output, shape index: {0}]   ;;  %s1278_s5 = inlined_call_operand.vmem [shape: f32[2,1,128], index: 5, kind: output, shape index: {1}]   ;;  %s1279_s6 = inlined_call_operand.vmem [shape: f32[2,1,128], index: 6, kind: output, shape index: {2}]  }
   0x1 LB: > { %s886_s22 = sadd.s32 4294967295, %s1033_s21   ;;  %p890_p0 = scmp.ge.s32.totalorder %s1033_s21, 1  ;;  %s1033_s21 = sphi %s1071_s21, %s17_s21  }
   0x2   : > { %p217_p1 = scmp.lt.s32.totalorder %s1033_s21, 3 }
   0x4   : > { %p218_p2 = pnand %p890_p0, %p217_p1 }
   0x5   : > { %v994_v0 = vld [vmem:[%s1274_s1] sm:$0xff] (!%p218_p2)   ;;  %v1035_v1 = vmov (!%p218_p2), 0   ;;  %p253_p3 = scmp.lt.s32.totalorder (!%p218_p2), %s886_s22, 1  ;;  %v995_v2 = vld [vmem:[%s1274_s1 + $0x8] sm:$0xff] (!%p218_p2)   ;;  %v996_v3 = vld [vmem:[%s1274_s1 + $0x10] sm:$0xff] (!%p218_p2)   ;;  %vm313_vm0 = vcmask (!%p218_p2), 60416  }
   0x6   : > { %221 = sbr.rel (%p218_p2) target bundleno = 314 (0x13a), region = 36  ;;  %588 = vmatprep.subr.bf16.mxu0 (!%p218_p2), %v1035_v1  ;;  %490 = vmatprep.subr.bf16.mxu1 (!%p218_p2), %v1035_v1  ;;  %vm295_vm1 = vcmask (!%p218_p2), 1040384   ;;  %315 = vst.msk [vmem:[#allocation2 + $0xc] sm:$0xf] (!%p218_p2), %vm313_vm0, %v1035_v1  ;;  %v895_v5 = vld [vmem:[%s1275_s2] ss:$0 sm:$0xff] (!%p218_p2) }
   0x7   : > { %589 = vmatpush1.bf16.msra.mxu0 (!%p218_p2), %v994_v0  ;;  %vm298_vm2 = vcmask (!%p218_p2), 61444   ;;  %v997_v6 = vld [vmem:[%s1274_s1 + $0x18] sm:$0xff] (!%p218_p2)   ;;  %vm296_vm3 = vsmask.f32 (!%p218_p2), 256  ;;  %vm299_vm4 = vsmask.f32 (!%p218_p2), 4352 }
   0x8   : > { %590 = vmatprep.subr.bf16.mxu0 (!%p218_p2), %v1035_v1  ;;  %v896_v9 = vld [vmem:[%s1276_s3] ss:$0 sm:$0xff] (!%p218_p2)  ;;  %vm1111_vm5 = vmand (!%p218_p2), %vm295_vm1, %vm296_vm3  ;;  %vm307_vm7 = vsmask.f32 (!%p218_p2), 7954  ;;  %v310_v14 = vld [vmem:[#allocation2 + $0x10] sm:$0x11] (!%p218_p2) }
   0x9   : > { %v302_v11 = vld [vmem:[#allocation2] sm:$0x11] (!%p218_p2)  ;;  %vm300_vm6 = vmand (!%p218_p2), %vm298_vm2, %vm299_vm4  ;;  %vm305_vm9 = vsmask.f32 (!%p218_p2), 7938  ;;  %vm316_vm12 = vcmask (!%p218_p2), 57344   ;;  %v1007_v23 = vld [vmem:[%s1274_s1 + $0x4c] sm:$0xff] (!%p218_p2)  }
   0xa   : > { %vm301_vm8 = vmor (!%p218_p2), %vm300_vm6, %vm1111_vm5  ;;  %v1003_v18 = vld [vmem:[%s1274_s1 + $0x44] sm:$0xff] (!%p218_p2)   ;;  %vm323_vm14 = vsmask.f32 (!%p218_p2), 4368  ;;  %vm345_vm15 = vcmask (!%p218_p2), 1043456   ;;  %v1009_v27 = vld [vmem:[%s1274_s1 + $0x54] sm:$0xff] (!%p218_p2)  }
   0xb   : > { %591 = vmatpush1.bf16.msra.mxu0 (!%p218_p2), %v995_v2  ;;  %v303_v17 = vsel (!%p218_p2), %vm301_vm8, 0, %v302_v11  ;;  %vm306_vm10 = vmand (!%p218_p2), %vm295_vm1, %vm305_vm9  ;;  %v998_v19 = vld [vmem:[%s1274_s1 + $0x20] sm:$0xff] (!%p218_p2)   ;;  %491 = vmatpush1.bf16.msra.mxu1 (!%p218_p2), %v1003_v18  ;;  %v999_v24 = vld [vmem:[%s1274_s1 + $0x28] sm:$0xff] (!%p218_p2)   ;;  %vm405_vm4 = vsmask.f32 (!%p218_p2), 7424 }
   0xc   : > { %592 = vmatprep.subr.bf16.mxu0 (!%p218_p2), %v1035_v1  ;;  %304 = vst [vmem:[#allocation2] sm:$0x11] (!%p218_p2), %v303_v17  ;;  %vm308_vm11 = vmand (!%p218_p2), %vm298_vm2, %vm307_vm7  ;;  %492 = vmatprep.subr.bf16.mxu1 (!%p218_p2), %v1035_v1  ;;  %v1000_v33 = vld [vmem:[%s1274_s1 + $0x30] sm:$0xff] (!%p218_p2)   ;;  %v1011_v42 = vld [vmem:[%s1274_s1 + $0x5c] sm:$0xff] (!%p218_p2)   ;;  %vm482_vm2 = vcmask (!%p218_p2), 64512  }
   0xd   : > { %s1287_s22 = smov (!%p253_p3, %s886_s22), 1  ;;  %vm309_vm13 = vmor %vm308_vm11, %vm306_vm10  ;;  %314 = vst.msk [vmem:[#allocation2 + $0x4] sm:$0xf] %vm313_vm0, %v1035_v1  ;;  %v1001_v44 = vld [vmem:[%s1274_s1 + $0x38] sm:$0xff]   ;;  %v1002_v48 = vld [vmem:[%s1274_s1 + $0x40] ss:$0 sps:$4 sm:$0xff]  }
   0xe   : > { %s971_s27 = sshll.u32 %s1287_s22, 3  ;;  %v311_v22 = vsel %vm309_vm13, 0, %v310_v14  ;;  %vm1145_vm0 = vmor %vm296_vm3, %vm323_vm14  ;;  %v1013_v49 = vld [vmem:[%s1274_s1 + $0x64] sm:$0xff]   ;;  %v586_v50 = vsel %vm345_vm15, %v1002_v48, 0  ;;  %v1015_v51 = vld [vmem:[%s1274_s1 + $0x6c] sm:$0xff]   ;;  %vm653_vm3 = vcmask 1046528   ;;  %s265_s25 = scalar_lea.vmem %s1278_s5, %s1287_s22 }
   0xf   : > { %s257_s8 = scalar_lea.vmem %s1273_s0, %s971_s27  ;;  %593 = vmatpush1.bf16.msra.mxu0 %v996_v3  ;;  %312 = vst [vmem:[#allocation2 + $0x10] sm:$0x11] %v311_v22  ;;  %493 = vmatpush1.bf16.msra.mxu1 %v1007_v23  ;;  %vm1155_vm1 = vmand %vm345_vm15, %vm305_vm9  ;;  %v1006_v57 = vld [vmem:[%s1274_s1 + $0x88] sm:$0xff]   ;;  %v1017_v60 = vld [vmem:[%s1274_s1 + $0x74] sm:$0xff]   ;;  %s972_s17 = sshll.u32 %s1287_s22, 4 }
  0x10   : > { %v976_v4 = vld [vmem:[%s257_s8] sm:$0xff]   ;;  %594 = vmatprep.subr.bf16.mxu0 %v1035_v1  ;;  %317 = vst.msk [vmem:[#allocation2 + $0x14] sm:$0x1] %vm316_vm12, %v1035_v1  ;;  %494 = vmatprep.subr.bf16.mxu1 %v1035_v1  ;;  %v1014_v23 = vld [vmem:[%s1274_s1 + $0xa8] sm:$0xff]   ;;  %s262_s20 = scalar_lea.vmem %s1277_s4, %s972_s17  ;;  %s268_s28 = scalar_lea.vmem %s1279_s6, %s1287_s22 }
  0x11   : > { %v977_v7 = vunpack.c.l.bf16 %v976_v4  ;;  %v978_v8 = vunpack.c.h.bf16 %v976_v4  ;;  %v1021_v14 = vld [vmem:[%s1274_s1 + $0x84] ss:$0 sps:$4 sm:$0xff]  }
  0x13   : > { %v281_v12 = vmul.f32 %v977_v7, %v895_v5  ;;  %v282_v13 = vmul.f32 %v978_v8, %v895_v5  ;;  %595 = vmatpush1.bf16.msra.mxu0 %v997_v6  ;;  %v347_v37 = vld [vmem:[#allocation2] sm:$0xf]  ;;  %495 = vmatpush1.bf16.msra.mxu1 %v1009_v27  ;;  %v1008_v6 = vld [vmem:[%s1274_s1 + $0x90] sm:$0xff]  }
  0x14   : > { %596 = vmatprep.subr.bf16.mxu0 %v1035_v1  ;;  %496 = vmatprep.subr.bf16.mxu1 %v1035_v1 }
  0x15   : > { %v290_v15 = vadd.f32 %v896_v9, %v281_v12  ;;  %v291_v16 = vadd.f32 %v896_v9, %v282_v13  ;;  %v1019_v9 = vld [vmem:[%s1274_s1 + $0x7c] sm:$0xff]  }
  0x16   : > { %v351_v43 = vld [vmem:[#allocation2 + $0x10] sm:$0x1] }
  0x17   : > { %v292_v20 = vmax.f32 %v290_v15, 0.0  ;;  %v293_v21 = vmax.f32 %v291_v16, 0.0  ;;  %597 = vmatpush1.bf16.msra.mxu0 %v998_v19  ;;  %497 = vmatpush1.bf16.msra.mxu1 %v1011_v42  ;;  %v1010_v16 = vld [vmem:[%s1274_s1 + $0x98] sm:$0xff]  }
  0x18   : > { %598 = vmatprep.subr.bf16.mxu0 %v1035_v1  ;;  %498 = vmatprep.subr.bf16.mxu1 %v1035_v1 }
  0x19   : > { %v973_v25 = vpack.c.bf16 %v292_v20, %v292_v20  ;;  %v974_v26 = vpack.c.bf16 %v293_v21, %v293_v21  ;;  %v488_v20 = vsel %vm345_vm15, %v1021_v14, 0  ;;  %v1012_v21 = vld [vmem:[%s1274_s1 + $0xa0] sm:$0xff]  }
  0x1b   : > { %v326_v28 = vshrl.u32 %v973_v25, 16  ;;  %v329_v29 = vshll.u32 %v973_v25, 16  ;;  %v334_v30 = vshrl.u32 %v974_v26, 16  ;;  %v337_v31 = vshll.u32 %v974_v26, 16  ;;  %599 = vmatpush1.bf16.msra.mxu0 %v999_v24  ;;  %499 = vmatpush1.bf16.msra.mxu1 %v1013_v49  ;;  %v1016_v24 = vld [vmem:[%s1274_s1 + $0xb0] sm:$0xff]   ;;  %v1018_v25 = vld [vmem:[%s1274_s1 + $0xb8] sm:$0xff]  }
  0x1c   : > { %600 = vmatprep.subr.bf16.mxu0 %v1035_v1  ;;  %500 = vmatprep.subr.bf16.mxu1 %v1035_v1  ;;  %v1020_v26 = vld [vmem:[%s1274_s1 + $0xc0] sm:$0xff]  }
  0x1d   : > { %v328_v34 = vrot.slane %v326_v28, 7  ;;  %v336_v35 = vrot.slane %v334_v30, 7  ;;  %v1024_v28 = vld [vmem:[%s1274_s1 + $0xc8] ss:$0 sps:$4 sm:$0xff]  }
  0x1f   : > { %v331_v38 = vor.u32 %v329_v29, %v328_v34  ;;  %v332_v39 = vrot.slane %v328_v34, 4  ;;  %v339_v40 = vor.u32 %v337_v31, %v336_v35  ;;  %v341_v41 = vrot.slane %v336_v35, 4  ;;  %601 = vmatpush1.bf16.msra.mxu0 %v1000_v33  ;;  %501 = vmatpush1.bf16.msra.mxu1 %v1015_v51 }
  0x20   : > { %602 = vmatprep.subr.bf16.mxu0 %v1035_v1  ;;  %502 = vmatprep.subr.bf16.mxu1 %v1035_v1  ;;  %v716_v31 = vsel %vm345_vm15, %v1024_v28, 0 }
  0x21   : > { %v340_v45 = vsel %vm1145_vm0, %v332_v39, %v339_v40  ;;  %v348_v46 = vsel %vm1155_vm1, %v331_v38, %v347_v37  ;;  %v352_v47 = vsel %vm1111_vm5, %v341_v41, %v351_v43 }
  0x22   : > { %349 = vst [vmem:[#allocation2] sm:$0xf] %v348_v46  ;;  %350 = vst [vmem:[#allocation2 + $0x8] sm:$0xf] %v340_v45 }
  0x23   : > { %353 = vst [vmem:[#allocation2 + $0x10] sm:$0x1] %v352_v47  ;;  %603 = vmatpush1.bf16.msra.mxu0 %v1001_v44  ;;  %503 = vmatpush1.bf16.msra.mxu1 %v1017_v60 }
  0x24   : > { %604 = vmatprep.subr.bf16.mxu0 %v1035_v1  ;;  %504 = vmatprep.subr.bf16.mxu1 %v1035_v1 }
  0x27   : > { %605 = vmatpush1.bf16.msra.mxu0 %v586_v50  ;;  %505 = vmatpush1.bf16.msra.mxu1 %v1019_v9 }
  0x28   : > { %718 = vmatprep.subr.bf16.mxu0 %v1035_v1  ;;  %506 = vmatprep.subr.bf16.mxu1 %v1035_v1 }
  0x29   : > { %v354_v52 = vld [vmem:[#allocation2] sm:$0xff]  ;;  %v1187_v53 = vld [vmem:[#allocation2 + $0x8] sm:$0xff] }
  0x2a   : > { %v373_v54 = vld [vmem:[#allocation2 + $0x10] sm:$0x11]  ;;  %v917_v55 = vcombine.high %v354_v52, %v1187_v53  ;;  %v916_v56 = vcombine.low %v354_v52, %v1187_v53  ;;  %v1194_v59 = vld [vmem:[#allocation2] sm:$0xee] }
  0x2b   : > { %v919_v58 = vcombine.high %v373_v54, %v373_v54  ;;  %v1200_v61 = vcombine.low %v373_v54, %v373_v54  ;;  %v958_v62 = vcombine.high %v1194_v59, %v1187_v53  ;;  %507 = vmatpush1.bf16.msra.mxu1 %v488_v20  ;;  %v957_v27 = vcombine.low %v1194_v59, %v1187_v53 }
  0x2c   : > { %939 = vmatprep.mubr.msk.bf16.mxu0 %vm482_vm2, %v917_v55  ;;  %v409_v63 = vshll.u32 %v916_v56, 16  ;;  %v419_v0 = vshrl.u32 %v917_v55, 16  ;;  %v421_v2 = vshll.u32 %v917_v55, 16  ;;  %v407_v10 = vshrl.u32 %v916_v56, 16 }
  0x2d   : > { %v426_v3 = vshll.u32 %v919_v58, 16  ;;  %621 = vmatmul.mubr.bf16.vlgmr.msra.gmra.mrb[0].mxu0 %v916_v56  ;;  %v657_v4 = vrot.slane %v958_v62, 1  ;;  %v658_v5 = vrot.slane %v919_v58, 1  ;;  %v414_v12 = vshll.u32 %v1200_v61, 16 }
  0x2e   : > { %719 = vmatpush1.bf16.msra.mxu0 %v1006_v57  ;;  %v423_v7 = vrot.slane %v421_v2, 1  ;;  %v411_v11 = vrot.slane %v409_v63, 1  ;;  %v654_v29 = vrot.slane %v957_v27, 1  ;;  %v655_v30 = vrot.slane %v1200_v61, 1 }
  0x2f   : > { %v428_v8 = vrot.slane %v426_v3, 1  ;;  %720 = vmatprep.subr.bf16.mxu0 %v1035_v1  ;;  %v659_v13 = vsel %vm653_vm3, %v657_v4, %v658_v5  ;;  %v416_v19 = vrot.slane %v414_v12, 1 }
  0x30   : > { %v424_v15 = vor.u32 %v423_v7, %v419_v0  ;;  %968 = vmatprep.mubr.msk.bf16.mxu0 %vm482_vm2, %v659_v13  ;;  %v412_v18 = vor.u32 %v411_v11, %v407_v10  ;;  %v656_v32 = vsel %vm653_vm3, %v654_v29, %v655_v30 }
  0x32   : > { %721 = vmatpush1.bf16.msra.mxu0 %v1008_v6  ;;  %v429_v17 = vsel %vm405_vm4, %v424_v15, %v428_v8  ;;  %v417_v22 = vsel %vm405_vm4, %v412_v18, %v416_v19 }
  0x33   : > { %722 = vmatprep.subr.bf16.mxu0 %v1035_v1  ;;  %929 = vmatprep.mubr.msk.bf16.mxu1 %vm482_vm2, %v429_v17 }
  0x34   : > { %523 = vmatmul.mubr.bf16.vlgmr.msra.gmra.mrb[0].mxu1 %v417_v22 }
  0x36   : > { %723 = vmatpush1.bf16.msra.mxu0 %v1010_v16 }
  0x37   : > { %724 = vmatprep.subr.bf16.mxu0 %v1035_v1 }
  0x3a   : > { %725 = vmatpush1.bf16.msra.mxu0 %v1012_v21 }
  0x3b   : > { %726 = vmatprep.subr.bf16.mxu0 %v1035_v1 }
  0x3e   : > { %727 = vmatpush1.bf16.msra.mxu0 %v1014_v23 }
  0x3f   : > { %728 = vmatprep.subr.bf16.mxu0 %v1035_v1 }
  0x42   : > { %729 = vmatpush1.bf16.msra.mxu0 %v1016_v24 }
  0x43   : > { %730 = vmatprep.subr.bf16.mxu0 %v1035_v1 }
  0x46   : > { %731 = vmatpush1.bf16.msra.mxu0 %v1018_v25 }
  0x47   : > { %732 = vmatprep.subr.bf16.mxu0 %v1035_v1 }
  0x4a   : > { %733 = vmatpush1.bf16.msra.mxu0 %v1020_v26 }
  0x4b   : > { %734 = vmatprep.subr.bf16.mxu0 %v1035_v1 }
  0x4e   : > { %735 = vmatpush1.bf16.msra.mxu0 %v716_v31 }
  0x51   : > { %751 = vmatmul.mubr.bf16.vlgmr.msra.gmra.mrb[0].mxu0 %v656_v32 }
 0x107   : > { %v524_v33 = vpop.f32.mrb[0].mxu1 }
 0x108   : > { %v526_v34 = vpop.f32.mrb[1].mxu1 }
 0x109   : > { %v527_v35 = vpop.f32.mrb[2].mxu1 }
 0x10a   : > { %v529_v36 = vpop.f32.mrb[3].mxu1 }
 0x124   : > { %v752_v37 = vpop.f32.mrb[0].mxu0 }
 0x125   : > { %v979_v38 = vadd.f32 %v752_v37, %v524_v33  ;;  %v754_v39 = vpop.f32.mrb[1].mxu0 }
 0x126   : > { %v755_v40 = vpop.f32.mrb[2].mxu0 }
 0x127   : > { %761 = vst [vmem:[%s262_s20] sm:$0xff] %v979_v38  ;;  %v980_v1 = vadd.f32 %v755_v40, %v527_v35  ;;  %v757_v41 = vpop.f32.mrb[3].mxu0  ;;  %v771_v42 = vmul.f32 %v979_v38, %v979_v38 }
 0x129   : > { %762 = vst [vmem:[%s262_s20 + $0x8] sm:$0xff] %v980_v1  ;;  %v763_v43 = vadd.f32 %v980_v1, %v979_v38  ;;  %v772_v44 = vmul.f32 %v980_v1, %v980_v1 }
 0x12b   : > { %v764_v45 = vrot.slane %v763_v43, 4  ;;  %v773_v46 = vadd.f32 %v772_v44, %v771_v42 }
 0x12d   : > { %v765_v47 = vadd.f32 %v764_v45, %v763_v43  ;;  %v774_v48 = vrot.slane %v773_v46, 4 }
 0x12f   : > { %v766_v49 = vrot.slane %v765_v47, 2  ;;  %v775_v50 = vadd.f32 %v774_v48, %v773_v46 }
 0x131   : > { %v767_v51 = vadd.f32 %v766_v49, %v765_v47  ;;  %v776_v52 = vrot.slane %v775_v50, 2 }
 0x133   : > { %v768_v53 = vrot.slane %v767_v51, 1  ;;  %v777_v54 = vadd.f32 %v776_v52, %v775_v50 }
 0x135   : > { %v769_v55 = vadd.f32 %v768_v53, %v767_v51  ;;  %v778_v56 = vrot.slane %v777_v54, 1 }
 0x137   : > { %770 = vst [vmem:[%s265_s25] sm:$0x1] %v769_v55  ;;  %v779_v57 = vadd.f32 %v778_v56, %v777_v54 }
 0x139   : > { %780 = vst [vmem:[%s268_s28] sm:$0x1] %v779_v57 }
 0x13a PF: > { %s17_s21 = sadd.s32 1, %s1033_s21  }
 0x13b   : > { %p14_p4 = scmp.ge.s32.totalorder %s17_s21, 4  }
 0x13d   :  { %16 = sbr.rel (!%p14_p4) target bundleno = 1 (0x1), region = 92 }

</bundles_post_ra>
